<compile_context>
chip_gen: v7x
topology: tpu7x:2x2x1
jax: 0.10.0
libtpu: 0.0.40
codegen_flags: <defaults>
</compile_context>

<pallas_src>
import jax
import jax.numpy as jnp
from jax.experimental import pallas as pl
from jax.experimental.pallas import tpu as pltpu

IN_DIM = 28 * 28          # 784
HID_DIM = 128
ENC_DIM = 32
NOISE_STD = 0.1


def _cdiv(a, b):
    return -(-a // b)


def _round_up(x, m):
    return _cdiv(x, m) * m


def _stoch_ae_kernel(x_ref, noise_ref, w1_ref, b1_ref, w2_ref, b2_ref,
                     w3_ref, b3_ref, w4_ref, b4_ref, out_ref):
    # x tile: (TB, 784) bf16 straight from HBM; accumulate in f32 on the MXU.
    x = x_ref[...]

    # encoder: Linear(784->128) + ReLU
    h1 = jnp.dot(x, w1_ref[...], preferred_element_type=jnp.float32) + b1_ref[...]
    h1 = jnp.maximum(h1, 0.0)

    # encoder: Linear(128->32)
    enc = jnp.dot(h1.astype(jnp.bfloat16), w2_ref[...],
                  preferred_element_type=jnp.float32) + b2_ref[...]

    # stochastic bottleneck: encoded + noise_std * randn_like(encoded)
    enc = enc + NOISE_STD * noise_ref[...]

    # decoder: Linear(32->128) + ReLU
    h2 = jnp.dot(enc.astype(jnp.bfloat16), w3_ref[...],
                 preferred_element_type=jnp.float32) + b3_ref[...]
    h2 = jnp.maximum(h2, 0.0)

    # decoder: Linear(128->784) + Sigmoid (single EUP transcendental, no inf path)
    logits = jnp.dot(h2.astype(jnp.bfloat16), w4_ref[...],
                     preferred_element_type=jnp.float32) + b4_ref[...]
    out_ref[...] = 0.5 * jnp.tanh(0.5 * logits) + 0.5


def stochastic_autoencoder_forward(x_nchw, params, noise):
    """x_nchw: (B, 1, 28, 28) float; noise: (B, ENC_DIM) standard normal."""
    B = x_nchw.shape[0]
    # Cast to bf16 in the wrapper (fuses with the reshape) so the kernel DMAs
    # half the input bytes; the matmul consumed bf16 anyway.
    x2d = x_nchw.reshape(B, IN_DIM).astype(jnp.bfloat16)
    noise = noise.astype(jnp.float32)

    w1, b1, w2, b2, w3, b3, w4, b4 = params

    # --- cast weights to bf16 once (not per grid step) -----------------------
    w1b = w1.astype(jnp.bfloat16)
    w2b = w2.astype(jnp.bfloat16)
    w3b = w3.astype(jnp.bfloat16)
    w4b = w4.astype(jnp.bfloat16)

    # --- batch tiling ---------------------------------------------------------
    # >=4 grid steps when the batch allows (pipeline overlap + both v7x TCs),
    # TB capped ~512 (safe under v7x's 64 MiB VMEM), multiple of 16 for bf16
    # sublane packing.  For larger batches TB divides B evenly (no wasted tail).
    target_blocks = max(4, _cdiv(B, 512))
    TB = max(16, _round_up(_cdiv(B, target_blocks), 16))
    B_pad = _round_up(B, TB)
    if B_pad != B:   # only for small / ragged batches; no-op when TB | B
        x2d = jnp.pad(x2d, ((0, B_pad - B), (0, 0)))
        noise = jnp.pad(noise, ((0, B_pad - B), (0, 0)))
    grid = (B_pad // TB,)

    batch_spec = lambda shape: pl.BlockSpec(shape, lambda i: (i, 0))
    const_spec = lambda shape: pl.BlockSpec(shape, lambda i: (0, 0))

    out2d = pl.pallas_call(
        _stoch_ae_kernel,
        out_shape=jax.ShapeDtypeStruct((B_pad, IN_DIM), jnp.float32),
        grid_spec=pltpu.PrefetchScalarGridSpec(
            num_scalar_prefetch=0,
            grid=grid,
            in_specs=[
                batch_spec((TB, IN_DIM)),         # x (bf16, pipelined over batch)
                batch_spec((TB, ENC_DIM)),        # noise
                const_spec((IN_DIM, HID_DIM)),    # w1 (bf16, VMEM-resident)
                const_spec((1, HID_DIM)),         # b1
                const_spec((HID_DIM, ENC_DIM)),   # w2
                const_spec((1, ENC_DIM)),         # b2
                const_spec((ENC_DIM, HID_DIM)),   # w3
                const_spec((1, HID_DIM)),         # b3
                const_spec((HID_DIM, IN_DIM)),    # w4
                const_spec((1, IN_DIM)),          # b4
            ],
            out_specs=batch_spec((TB, IN_DIM)),
        ),
        compiler_params=pltpu.CompilerParams(
            dimension_semantics=("parallel",),       # megacore-friendly batch axis
            vmem_limit_bytes=48 * 1024 * 1024,       # safe on v5e/v6e/v7x
        ),
    )(x2d, noise, w1b, b1, w2b, b2, w3b, b3, w4b, b4)

    out2d = out2d[:B] if B_pad != B else out2d
    return out2d.reshape(B, 1, 28, 28)


def init_params(key):
    """Deterministic init matching PyTorch Linear default: U(-1/sqrt(fan_in), +)."""
    def linear(key, fan_in, fan_out):
        kw, kb = jax.random.split(key)
        bound = 1.0 / jnp.sqrt(fan_in)
        w = jax.random.uniform(kw, (fan_in, fan_out), jnp.float32, -bound, bound)
        b = jax.random.uniform(kb, (1, fan_out), jnp.float32, -bound, bound)
        return w, b

    k1, k2, k3, k4 = jax.random.split(key, 4)
    w1, b1 = linear(k1, IN_DIM, HID_DIM)
    w2, b2 = linear(k2, HID_DIM, ENC_DIM)
    w3, b3 = linear(k3, ENC_DIM, HID_DIM)
    w4, b4 = linear(k4, HID_DIM, IN_DIM)
    return (w1, b1, w2, b2, w3, b3, w4, b4)


def reference_forward(x_nchw, params, noise):
    """Pure f32 JAX reference (PyTorch-equivalent math)."""
    w1, b1, w2, b2, w3, b3, w4, b4 = params
    x = x_nchw.reshape(x_nchw.shape[0], IN_DIM)
    h1 = jnp.maximum(x @ w1 + b1, 0.0)
    enc = h1 @ w2 + b2 + NOISE_STD * noise
    h2 = jnp.maximum(enc @ w3 + b3, 0.0)
    dec = jax.nn.sigmoid(h2 @ w4 + b4)
    return dec.reshape(-1, 1, 28, 28)


if __name__ == "__main__":
    key = jax.random.PRNGKey(0)
    k_params, k_x, k_noise = jax.random.split(key, 3)

    B = 2
    params = init_params(k_params)
    x = jax.random.uniform(k_x, (B, 1, 28, 28), jnp.float32)
    noise = jax.random.normal(k_noise, (B, ENC_DIM), jnp.float32)

    out = stochastic_autoencoder_forward(x, params, noise)
    out = jax.block_until_ready(out)

    ref = reference_forward(x, params, noise)
    assert out.shape == (B, 1, 28, 28)
    # Intentional precision contract: bf16 MXU inputs with f32 accumulation.
    assert jnp.allclose(out, ref, atol=2e-2, rtol=2e-2), "mismatch vs JAX reference"
    assert bool(jnp.all(jnp.isfinite(out))), "non-finite output"

    print("KERNEL_OK")
</pallas_src>

<mosaic_0001>
module attributes {stable_mosaic.version = 11 : i64} {
  func.func @_stoch_ae_kernel(%arg0: i32, %arg1: memref<16x784xbf16, #tpu.memory_space<vmem>>, %arg2: memref<16x32xf32, #tpu.memory_space<vmem>>, %arg3: memref<784x128xbf16, #tpu.memory_space<vmem>>, %arg4: memref<1x128xf32, #tpu.memory_space<vmem>>, %arg5: memref<128x32xbf16, #tpu.memory_space<vmem>>, %arg6: memref<1x32xf32, #tpu.memory_space<vmem>>, %arg7: memref<32x128xbf16, #tpu.memory_space<vmem>>, %arg8: memref<1x128xf32, #tpu.memory_space<vmem>>, %arg9: memref<128x784xbf16, #tpu.memory_space<vmem>>, %arg10: memref<1x784xf32, #tpu.memory_space<vmem>>, %arg11: memref<16x784xf32, #tpu.memory_space<vmem>>) attributes {dimension_semantics = [#tpu.dimension_semantics<parallel>], iteration_bounds = array<i64: 1>, scalar_prefetch = 0 : i64, scratch_operands = 0 : i64, tpu.core_type = #tpu.core_type<tc>, window_params = [{transform_indices = @transform_0, window_bounds = array<i64: 16, 784>}, {transform_indices = @transform_1, window_bounds = array<i64: 16, 32>}, {pipeline_mode = #tpu.pipeline_mode<synchronous>, transform_indices = @transform_2, window_bounds = array<i64: 784, 128>}, {pipeline_mode = #tpu.pipeline_mode<synchronous>, transform_indices = @transform_3, window_bounds = array<i64: 1, 128>}, {pipeline_mode = #tpu.pipeline_mode<synchronous>, transform_indices = @transform_4, window_bounds = array<i64: 128, 32>}, {pipeline_mode = #tpu.pipeline_mode<synchronous>, transform_indices = @transform_5, window_bounds = array<i64: 1, 32>}, {pipeline_mode = #tpu.pipeline_mode<synchronous>, transform_indices = @transform_6, window_bounds = array<i64: 32, 128>}, {pipeline_mode = #tpu.pipeline_mode<synchronous>, transform_indices = @transform_7, window_bounds = array<i64: 1, 128>}, {pipeline_mode = #tpu.pipeline_mode<synchronous>, transform_indices = @transform_8, window_bounds = array<i64: 128, 784>}, {pipeline_mode = #tpu.pipeline_mode<synchronous>, transform_indices = @transform_9, window_bounds = array<i64: 1, 784>}, {transform_indices = @transform_10, window_bounds = array<i64: 16, 784>}]} {
    %c0 = arith.constant 0 : index
    %c0_0 = arith.constant 0 : index
    %0 = vector.load %arg1[%c0, %c0_0] : memref<16x784xbf16, #tpu.memory_space<vmem>>, vector<16x784xbf16>
    %c0_1 = arith.constant 0 : index
    %c0_2 = arith.constant 0 : index
    %1 = vector.load %arg3[%c0_1, %c0_2] : memref<784x128xbf16, #tpu.memory_space<vmem>>, vector<784x128xbf16>
    %cst = arith.constant dense<0.000000e+00> : vector<16x128xf32>
    %2 = tpu.matmul %0, %1, %cst {dimension_numbers = #tpu.dot_dimension_numbers<[1], [0], [0], [1], [0, 0, 1, 1], [], []>} : vector<16x784xbf16>, vector<784x128xbf16>, vector<16x128xf32> -> vector<16x128xf32>
    %c0_3 = arith.constant 0 : index
    %c0_4 = arith.constant 0 : index
    %3 = vector.load %arg4[%c0_3, %c0_4] : memref<1x128xf32, #tpu.memory_space<vmem>>, vector<1x128xf32>
    %4 = vector.broadcast %3 : vector<1x128xf32> to vector<16x128xf32>
    %5 = arith.addf %2, %4 : vector<16x128xf32>
    %cst_5 = arith.constant 0.000000e+00 : f32
    %6 = vector.broadcast %cst_5 : f32 to vector<16x128xf32>
    %7 = arith.maximumf %5, %6 : vector<16x128xf32>
    %8 = arith.truncf %7 : vector<16x128xf32> to vector<16x128xbf16>
    %c0_6 = arith.constant 0 : index
    %c0_7 = arith.constant 0 : index
    %9 = vector.load %arg5[%c0_6, %c0_7] : memref<128x32xbf16, #tpu.memory_space<vmem>>, vector<128x32xbf16>
    %cst_8 = arith.constant dense<0.000000e+00> : vector<16x32xf32>
    %10 = tpu.matmul %8, %9, %cst_8 {dimension_numbers = #tpu.dot_dimension_numbers<[1], [0], [0], [1], [0, 0, 1, 1], [], []>} : vector<16x128xbf16>, vector<128x32xbf16>, vector<16x32xf32> -> vector<16x32xf32>
    %c0_9 = arith.constant 0 : index
    %c0_10 = arith.constant 0 : index
    %11 = vector.load %arg6[%c0_9, %c0_10] : memref<1x32xf32, #tpu.memory_space<vmem>>, vector<1x32xf32>
    %12 = vector.broadcast %11 : vector<1x32xf32> to vector<16x32xf32>
    %13 = arith.addf %10, %12 : vector<16x32xf32>
    %c0_11 = arith.constant 0 : index
    %c0_12 = arith.constant 0 : index
    %14 = vector.load %arg2[%c0_11, %c0_12] : memref<16x32xf32, #tpu.memory_space<vmem>>, vector<16x32xf32>
    %cst_13 = arith.constant 1.000000e-01 : f32
    %15 = vector.broadcast %cst_13 : f32 to vector<16x32xf32>
    %16 = arith.mulf %15, %14 : vector<16x32xf32>
    %17 = arith.addf %13, %16 : vector<16x32xf32>
    %18 = arith.truncf %17 : vector<16x32xf32> to vector<16x32xbf16>
    %c0_14 = arith.constant 0 : index
    %c0_15 = arith.constant 0 : index
    %19 = vector.load %arg7[%c0_14, %c0_15] : memref<32x128xbf16, #tpu.memory_space<vmem>>, vector<32x128xbf16>
    %cst_16 = arith.constant dense<0.000000e+00> : vector<16x128xf32>
    %20 = tpu.matmul %18, %19, %cst_16 {dimension_numbers = #tpu.dot_dimension_numbers<[1], [0], [0], [1], [0, 0, 1, 1], [], []>} : vector<16x32xbf16>, vector<32x128xbf16>, vector<16x128xf32> -> vector<16x128xf32>
    %c0_17 = arith.constant 0 : index
    %c0_18 = arith.constant 0 : index
    %21 = vector.load %arg8[%c0_17, %c0_18] : memref<1x128xf32, #tpu.memory_space<vmem>>, vector<1x128xf32>
    %22 = vector.broadcast %21 : vector<1x128xf32> to vector<16x128xf32>
    %23 = arith.addf %20, %22 : vector<16x128xf32>
    %cst_19 = arith.constant 0.000000e+00 : f32
    %24 = vector.broadcast %cst_19 : f32 to vector<16x128xf32>
    %25 = arith.maximumf %23, %24 : vector<16x128xf32>
    %26 = arith.truncf %25 : vector<16x128xf32> to vector<16x128xbf16>
    %c0_20 = arith.constant 0 : index
    %c0_21 = arith.constant 0 : index
    %27 = vector.load %arg9[%c0_20, %c0_21] : memref<128x784xbf16, #tpu.memory_space<vmem>>, vector<128x784xbf16>
    %cst_22 = arith.constant dense<0.000000e+00> : vector<16x784xf32>
    %28 = tpu.matmul %26, %27, %cst_22 {dimension_numbers = #tpu.dot_dimension_numbers<[1], [0], [0], [1], [0, 0, 1, 1], [], []>} : vector<16x128xbf16>, vector<128x784xbf16>, vector<16x784xf32> -> vector<16x784xf32>
    %c0_23 = arith.constant 0 : index
    %c0_24 = arith.constant 0 : index
    %29 = vector.load %arg10[%c0_23, %c0_24] : memref<1x784xf32, #tpu.memory_space<vmem>>, vector<1x784xf32>
    %30 = vector.broadcast %29 : vector<1x784xf32> to vector<16x784xf32>
    %31 = arith.addf %28, %30 : vector<16x784xf32>
    %cst_25 = arith.constant 5.000000e-01 : f32
    %32 = vector.broadcast %cst_25 : f32 to vector<16x784xf32>
    %33 = arith.mulf %32, %31 : vector<16x784xf32>
    %34 = math.tanh %33 : vector<16x784xf32>
    %cst_26 = arith.constant 5.000000e-01 : f32
    %35 = vector.broadcast %cst_26 : f32 to vector<16x784xf32>
    %36 = arith.mulf %35, %34 : vector<16x784xf32>
    %cst_27 = arith.constant 5.000000e-01 : f32
    %37 = vector.broadcast %cst_27 : f32 to vector<16x784xf32>
    %38 = arith.addf %36, %37 : vector<16x784xf32>
    %c0_28 = arith.constant 0 : index
    %c0_29 = arith.constant 0 : index
    %39 = vector.load %arg11[%c0_28, %c0_29] : memref<16x784xf32, #tpu.memory_space<vmem>>, vector<16x784xf32>
    tpu.vector_store %arg11[%c0_28, %c0_29], %38 {strides = array<i32>} : memref<16x784xf32, #tpu.memory_space<vmem>>, vector<16x784xf32>,
    return
  }
  func.func @transform_0(%arg0: i32) -> (i32, i32) {
    %c0_i32 = arith.constant 0 : i32
    %c0_i32_0 = arith.constant 0 : i32
    return %arg0, %c0_i32 : i32, i32
  }
  func.func @transform_1(%arg0: i32) -> (i32, i32) {
    %c0_i32 = arith.constant 0 : i32
    %c0_i32_0 = arith.constant 0 : i32
    return %arg0, %c0_i32 : i32, i32
  }
  func.func @transform_2(%arg0: i32) -> (i32, i32) {
    %c0_i32 = arith.constant 0 : i32
    %c0_i32_0 = arith.constant 0 : i32
    %c0_i32_1 = arith.constant 0 : i32
    return %c0_i32, %c0_i32_0 : i32, i32
  }
  func.func @transform_3(%arg0: i32) -> (i32, i32) {
    %c0_i32 = arith.constant 0 : i32
    %c0_i32_0 = arith.constant 0 : i32
    %c0_i32_1 = arith.constant 0 : i32
    return %c0_i32, %c0_i32_0 : i32, i32
  }
  func.func @transform_4(%arg0: i32) -> (i32, i32) {
    %c0_i32 = arith.constant 0 : i32
    %c0_i32_0 = arith.constant 0 : i32
    %c0_i32_1 = arith.constant 0 : i32
    return %c0_i32, %c0_i32_0 : i32, i32
  }
  func.func @transform_5(%arg0: i32) -> (i32, i32) {
    %c0_i32 = arith.constant 0 : i32
    %c0_i32_0 = arith.constant 0 : i32
    %c0_i32_1 = arith.constant 0 : i32
    return %c0_i32, %c0_i32_0 : i32, i32
  }
  func.func @transform_6(%arg0: i32) -> (i32, i32) {
    %c0_i32 = arith.constant 0 : i32
    %c0_i32_0 = arith.constant 0 : i32
    %c0_i32_1 = arith.constant 0 : i32
    return %c0_i32, %c0_i32_0 : i32, i32
  }
  func.func @transform_7(%arg0: i32) -> (i32, i32) {
    %c0_i32 = arith.constant 0 : i32
    %c0_i32_0 = arith.constant 0 : i32
    %c0_i32_1 = arith.constant 0 : i32
    return %c0_i32, %c0_i32_0 : i32, i32
  }
  func.func @transform_8(%arg0: i32) -> (i32, i32) {
    %c0_i32 = arith.constant 0 : i32
    %c0_i32_0 = arith.constant 0 : i32
    %c0_i32_1 = arith.constant 0 : i32
    return %c0_i32, %c0_i32_0 : i32, i32
  }
  func.func @transform_9(%arg0: i32) -> (i32, i32) {
    %c0_i32 = arith.constant 0 : i32
    %c0_i32_0 = arith.constant 0 : i32
    %c0_i32_1 = arith.constant 0 : i32
    return %c0_i32, %c0_i32_0 : i32, i32
  }
  func.func @transform_10(%arg0: i32) -> (i32, i32) {
    %c0_i32 = arith.constant 0 : i32
    %c0_i32_0 = arith.constant 0 : i32
    return %arg0, %c0_i32 : i32, i32
  }
}

</mosaic_0001>

<bundles_post_ra>
// kernel: tpu_custom_call.1
= control target key start
LH: loop header
LB: loop body
LE: loop exit
PB: predicated region body
PF: predicated region fallthrough
CT: control target
= control target key end

     0   :  { %v1962_v38 = vmov 0.0   ;;  %vm1963_vm0 = vmmov 0   ;;  %vm479_vm1 = vcmask 130048   ;;  %s2467_s0 = inlined_call_operand.vmem [shape: bf16[16,784], index: 0, kind: input, shape index: {}]   ;;  %s2468_s1 = inlined_call_operand.vmem [shape: f32[16,32], index: 1, kind: input, shape index: {}]   ;;  %s2469_s2 = inlined_call_operand.vmem [shape: bf16[784,128], index: 2, kind: input, shape index: {}]   ;;  %s2470_s3 = inlined_call_operand.vmem [shape: f32[1,128], index: 3, kind: input, shape index: {}]   ;;  %s2471_s4 = inlined_call_operand.vmem [shape: bf16[128,32], index: 4, kind: input, shape index: {}]   ;;  %s2472_s5 = inlined_call_operand.vmem [shape: f32[1,32], index: 5, kind: input, shape index: {}]   ;;  %s2473_s6 = inlined_call_operand.vmem [shape: bf16[32,128], index: 6, kind: input, shape index: {}]   ;;  %s2474_s7 = inlined_call_operand.vmem [shape: f32[1,128], index: 7, kind: input, shape index: {}]   ;;  %s2475_s8 = inlined_call_operand.vmem [shape: bf16[128,784], index: 8, kind: input, shape index: {}]   ;;  %s2476_s9 = inlined_call_operand.vmem [shape: f32[1,784], index: 9, kind: input, shape index: {}]   ;;  %s2477_s10 = inlined_call_operand.hbm [shape: f32[16,784], index: 10, kind: output, shape index: {}]  }
   0x1   :  { %v1761_v0 = vld [vmem:[%s2469_s2 + $0x40] sm:$0xff]   ;;  %v1765_v4 = vld [vmem:[%s2469_s2 + $0x48] sm:$0xff]   ;;  %v1769_v8 = vld [vmem:[%s2469_s2 + $0x50] sm:$0xff]  }
   0x2   :  { %v1762_v1 = vld [vmem:[%s2469_s2] sm:$0xff]   ;;  %1612 = vmatprep.subr.bf16.mxu0 %v1761_v0  ;;  %v1766_v5 = vld [vmem:[%s2469_s2 + $0x8] sm:$0xff]   ;;  %v1770_v9 = vld [vmem:[%s2469_s2 + $0x10] sm:$0xff]  }
   0x3   :  { %v1763_v2 = vld [vmem:[%s2469_s2 + $0xc0] sm:$0xff]   ;;  %1613 = vmatpush3.bf16.msra.mxu0 %v1762_v1  ;;  %v1767_v6 = vld [vmem:[%s2469_s2 + $0xc8] sm:$0xff]   ;;  %v1771_v10 = vld [vmem:[%s2469_s2 + $0xd0] sm:$0xff]  }
   0x4   :  { %v1764_v3 = vld [vmem:[%s2469_s2 + $0x80] sm:$0xff]   ;;  %1634 = vmatprep.subr.bf16.mxu1 %v1763_v2  ;;  %1614 = vmatprep.subr.bf16.mxu0 %v1765_v4  ;;  %v1768_v7 = vld [vmem:[%s2469_s2 + $0x88] sm:$0xff]   ;;  %v1772_v11 = vld [vmem:[%s2469_s2 + $0x90] sm:$0xff]  }
   0x5   :  { %1635 = vmatpush3.bf16.msra.mxu1 %v1764_v3  ;;  %v1773_v12 = vld [vmem:[%s2469_s2 + $0x58] sm:$0xff]   ;;  %v1777_v16 = vld [vmem:[%s2469_s2 + $0x60] sm:$0xff]   ;;  %v1781_v20 = vld [vmem:[%s2469_s2 + $0x68] sm:$0xff]  }
   0x6   :  { %1636 = vmatprep.subr.bf16.mxu1 %v1767_v6  ;;  %v1774_v13 = vld [vmem:[%s2469_s2 + $0x18] sm:$0xff]   ;;  %v1778_v17 = vld [vmem:[%s2469_s2 + $0x20] sm:$0xff]   ;;  %v1782_v21 = vld [vmem:[%s2469_s2 + $0x28] sm:$0xff]  }
   0x7   :  { %1615 = vmatpush3.bf16.msra.mxu0 %v1766_v5  ;;  %v1775_v14 = vld [vmem:[%s2469_s2 + $0xd8] sm:$0xff]   ;;  %v1779_v18 = vld [vmem:[%s2469_s2 + $0xe0] sm:$0xff]   ;;  %v1783_v22 = vld [vmem:[%s2469_s2 + $0xe8] sm:$0xff]  }
   0x8   :  { %1616 = vmatprep.subr.bf16.mxu0 %v1769_v8  ;;  %v1776_v15 = vld [vmem:[%s2469_s2 + $0x98] sm:$0xff]   ;;  %v1780_v19 = vld [vmem:[%s2469_s2 + $0xa0] sm:$0xff]   ;;  %v1784_v23 = vld [vmem:[%s2469_s2 + $0xa8] sm:$0xff]  }
   0x9   :  { %1637 = vmatpush3.bf16.msra.mxu1 %v1768_v7  ;;  %v1785_v24 = vld [vmem:[%s2469_s2 + $0x70] sm:$0xff]   ;;  %v1789_v28 = vld [vmem:[%s2469_s2 + $0x78] sm:$0xff]   ;;  %v1794_v32 = vld [vmem:[%s2467_s0 + $0x4] ss:$28 sps:$4 sm:$0xff]  }
   0xa   :  { %1638 = vmatprep.subr.bf16.mxu1 %v1771_v10  ;;  %v1786_v25 = vld [vmem:[%s2469_s2 + $0x30] sm:$0xff]   ;;  %v1790_v29 = vld [vmem:[%s2469_s2 + $0x38] sm:$0xff]   ;;  %515 = vmatprep.mubr.bf16.mxu0 %v1794_v32  ;;  %v1796_v34 = vld [vmem:[%s2469_s2 + $0x140] sm:$0xff]  }
   0xb   :  { %1617 = vmatpush3.bf16.msra.mxu0 %v1770_v9  ;;  %v1787_v26 = vld [vmem:[%s2469_s2 + $0xf0] sm:$0xff]   ;;  %v1791_v30 = vld [vmem:[%s2469_s2 + $0xf8] sm:$0xff]   ;;  %v1797_v35 = vld [vmem:[%s2467_s0 + $0x8] ss:$28 sps:$4 sm:$0xff]  }
   0xc   :  { %1618 = vmatprep.subr.bf16.mxu0 %v1773_v12  ;;  %v1788_v27 = vld [vmem:[%s2469_s2 + $0xb0] sm:$0xff]   ;;  %v1792_v31 = vld [vmem:[%s2467_s0] ss:$28 sps:$4 sm:$0xff]   ;;  %v1799_v36 = vld [vmem:[%s2467_s0 + $0xc] ss:$28 sps:$4 sm:$0xff]  }
   0xd   :  { %1639 = vmatpush3.bf16.msra.mxu1 %v1772_v11  ;;  %v1795_v33 = vld [vmem:[%s2469_s2 + $0xb8] sm:$0xff]   ;;  %v1800_v37 = vld [vmem:[%s2469_s2 + $0x100] sm:$0xff]   ;;  %556 = vmatprep.mubr.bf16.mxu1 %v1799_v36  ;;  %v1801_v39 = vld [vmem:[%s2469_s2 + $0x148] sm:$0xff]  }
   0xe   :  { %1640 = vmatprep.subr.bf16.mxu1 %v1775_v14  ;;  %v1802_v40 = vld [vmem:[%s2469_s2 + $0x108] sm:$0xff]   ;;  %v1803_v41 = vld [vmem:[%s2469_s2 + $0x150] sm:$0xff]   ;;  %v1805_v43 = vld [vmem:[%s2469_s2 + $0x158] sm:$0xff]  }
   0xf   :  { %1619 = vmatpush3.bf16.msra.mxu0 %v1774_v13  ;;  %v1804_v42 = vld [vmem:[%s2469_s2 + $0x110] sm:$0xff]   ;;  %v1806_v44 = vld [vmem:[%s2469_s2 + $0x118] sm:$0xff]   ;;  %v1807_v45 = vld [vmem:[%s2469_s2 + $0x160] sm:$0xff]  }
  0x10   :  { %1620 = vmatprep.subr.bf16.mxu0 %v1777_v16  ;;  %v1808_v46 = vld [vmem:[%s2469_s2 + $0x120] sm:$0xff]   ;;  %v1809_v47 = vld [vmem:[%s2469_s2 + $0x168] sm:$0xff]   ;;  %v1818_v50 = vld [vmem:[%s2467_s0 + $0x14] ss:$28 sps:$4 sm:$0xff]  }
  0x11   :  { %1641 = vmatpush3.bf16.msra.mxu1 %v1776_v15  ;;  %v1815_v48 = vld [vmem:[%s2469_s2 + $0x180] sm:$0xff]   ;;  %v1810_v49 = vld [vmem:[%s2469_s2 + $0x128] sm:$0xff]   ;;  %v1811_v51 = vld [vmem:[%s2469_s2 + $0x170] sm:$0xff]  }
  0x12   :  { %1642 = vmatprep.subr.bf16.mxu1 %v1779_v18  ;;  %v1819_v52 = vld [vmem:[%s2467_s0 + $0x18] ss:$28 sps:$4 sm:$0xff]   ;;  %v1816_v56 = vld [vmem:[%s2467_s0 + $0x10] ss:$28 sps:$4 sm:$0xff]  }
  0x13   :  { %1621 = vmatpush3.bf16.msra.mxu0 %v1778_v17  ;;  %v1812_v53 = vld [vmem:[%s2469_s2 + $0x130] sm:$0xff]   ;;  %v1813_v54 = vld [vmem:[%s2469_s2 + $0x178] sm:$0xff]  }
  0x14   :  { %1622 = vmatprep.subr.bf16.mxu0 %v1781_v20  ;;  %v1814_v55 = vld [vmem:[%s2469_s2 + $0x138] sm:$0xff]  }
  0x15   :  { %1643 = vmatpush3.bf16.msra.mxu1 %v1780_v19 }
  0x16   :  { %1644 = vmatprep.subr.bf16.mxu1 %v1783_v22 }
  0x17   :  { %1623 = vmatpush3.bf16.msra.mxu0 %v1782_v21 }
  0x18   :  { %1624 = vmatprep.subr.bf16.mxu0 %v1785_v24 }
  0x19   :  { %1645 = vmatpush3.bf16.msra.mxu1 %v1784_v23 }
  0x1a   :  { %1646 = vmatprep.subr.bf16.mxu1 %v1787_v26 }
  0x1b   :  { %1625 = vmatpush3.bf16.msra.mxu0 %v1786_v25 }
  0x1c   :  { %1626 = vmatprep.subr.bf16.mxu0 %v1789_v28 }
  0x1d   :  { %1647 = vmatpush3.bf16.msra.mxu1 %v1788_v27 }
  0x1e   :  { %1648 = vmatprep.subr.bf16.mxu1 %v1791_v30 }
  0x1f   :  { %1627 = vmatpush3.bf16.msra.mxu0 %v1790_v29 }
  0x20   :  { %1656 = vmatprep.subr.bf16.mxu0 %v1796_v34 }
  0x21   :  { %1649 = vmatpush3.bf16.msra.mxu1 %v1795_v33 }
  0x22   :  { %516 = vmatmul.mubr.bf16.vlgmr.msra.gmra.mrb[0].mxu0 %v1792_v31  ;;  %1701 = vmatprep.subr.bf16.mxu1 %v1962_v38 }
  0x23   :  { %1657 = vmatpush3.bf16.msra.mxu0 %v1800_v37  ;;  %597 = vmatprep.mubr.bf16.mxu0 %v1818_v50 }
  0x24   :  { %557 = vmatmul.mubr.bf16.vlgmr.msra.gmra.mrb[0].mxu1 %v1797_v35  ;;  %1658 = vmatprep.subr.bf16.mxu0 %v1801_v39 }
  0x25   :  { %1703 = vmatprep.mubr.msk.bf16.mxu1 %vm1963_vm0, %v1962_v38  ;;  %1702 = vmatpush3.bf16.msra.mxu1 %v1815_v48 }
  0x26   :  { %1707 = vmatprep.subr.bf16.mxu1 %v1962_v38 }
  0x27   :  { %1659 = vmatpush3.bf16.msra.mxu0 %v1802_v40 }
  0x28   :  { %1660 = vmatprep.subr.bf16.mxu0 %v1803_v41 }
  0x2b   :  { %1661 = vmatpush3.bf16.msra.mxu0 %v1804_v42 }
  0x2c   :  { %1662 = vmatprep.subr.bf16.mxu0 %v1805_v43  ;;  %1704 = vmatmul.mubr.msk.bf16.vlgmr.msra.gmra.mrb[4].mxu1 %vm479_vm1, %v1819_v52 }
  0x2d   :  { %1723 = vmatprep.mubr.msk.bf16.mxu1 %vm1963_vm0, %v1962_v38 }
  0x2f   :  { %1663 = vmatpush3.bf16.msra.mxu0 %v1806_v44 }
  0x30   :  { %1664 = vmatprep.subr.bf16.mxu0 %v1807_v45 }
  0x33   :  { %1665 = vmatpush3.bf16.msra.mxu0 %v1808_v46 }
  0x34   :  { %1666 = vmatprep.subr.bf16.mxu0 %v1809_v47 }
  0x37   :  { %1667 = vmatpush3.bf16.msra.mxu0 %v1810_v49 }
  0x38   :  { %1668 = vmatprep.subr.bf16.mxu0 %v1811_v51 }
  0x3b   :  { %1669 = vmatpush3.bf16.msra.mxu0 %v1812_v53 }
  0x3c   :  { %1670 = vmatprep.subr.bf16.mxu0 %v1813_v54 }
  0x3f   :  { %1671 = vmatpush3.bf16.msra.mxu0 %v1814_v55 }
  0x40   :  { %1727 = vmatprep.subr.bf16.mxu0 %v1962_v38 }
  0x42   :  { %598 = vmatmul.mubr.bf16.vlgmr.msra.gmra.mrb[4].mxu0 %v1816_v56 }
  0x43   :  { %1731 = vmatprep.mubr.msk.bf16.mxu0 %vm1963_vm0, %v1962_v38 }
  0x44   :  { %15 = vsyncpa [#allocation3], 0  ;;  %v1820_v57 = vld [vmem:[%s2471_s4] sm:$0xff]   ;;  %v1821_v58 = vld [vmem:[%s2471_s4 + $0x8] sm:$0xff]   ;;  %vm792_vm2 = vcmask 261120  }
  0x45   :  { %1708 = vmatpush3.bf16.msra.mxu1 %v1820_v57  ;;  %v1822_v59 = vld [vmem:[%s2471_s4 + $0x10] sm:$0xff]   ;;  %v1823_v60 = vld [vmem:[%s2471_s4 + $0x18] sm:$0xff]   ;;  %v1824_v61 = vld [vmem:[%s2471_s4 + $0x20] sm:$0xff]  }
  0x46   :  { %1709 = vmatprep.subr.bf16.mxu1 %v1962_v38  ;;  %v1825_v62 = vld [vmem:[%s2471_s4 + $0x28] sm:$0xff]   ;;  %v1826_v63 = vld [vmem:[%s2471_s4 + $0x30] sm:$0xff]   ;;  %v1827_v0 = vld [vmem:[%s2471_s4 + $0x38] sm:$0xff]  }
  0x47   :  { %v1485_v2 = vld [vmem:[%s2470_s3] ss:$0 sm:$0xff]  ;;  %v1829_v36 = vld [vmem:[%s2473_s6 + $0x8] sm:$0xff]   ;;  %v1847_v43 = vld [vmem:[%s2475_s8 + $0x7c] ss:$28 sps:$4 sm:$0xff]  }
  0x48   :  { %v1828_v35 = vld [vmem:[%s2473_s6] sm:$0xff]   ;;  %v1835_v40 = vld [vmem:[%s2475_s8 + $0xc] ss:$28 sps:$4 sm:$0xff]   ;;  %v1845_v44 = vld [vmem:[%s2475_s8 + $0x78] ss:$28 sps:$4 sm:$0xff]  }
  0x49   :  { %1710 = vmatpush3.bf16.msra.mxu1 %v1821_v58  ;;  %1728 = vmatpush3.bf16.msra.mxu0 %v1828_v35  ;;  %v1832_v37 = vld [vmem:[%s2475_s8 + $0x4] ss:$28 sps:$4 sm:$0xff]   ;;  %v1853_v45 = vld [vmem:[%s2475_s8 + $0xb4] ss:$28 sps:$4 sm:$0xff]   ;;  %v1859_v47 = vld [vmem:[%s2475_s8 + $0xec] ss:$28 sps:$4 sm:$0xff]  }
  0x4a   :  { %1711 = vmatprep.subr.bf16.mxu1 %v1962_v38  ;;  %1729 = vmatprep.subr.bf16.mxu0 %v1962_v38  ;;  %v1833_v39 = vld [vmem:[%s2475_s8 + $0x8] ss:$28 sps:$4 sm:$0xff]   ;;  %v1839_v42 = vld [vmem:[%s2475_s8 + $0x40] ss:$28 sps:$4 sm:$0xff]   ;;  %v1851_v46 = vld [vmem:[%s2475_s8 + $0xb0] ss:$28 sps:$4 sm:$0xff]  }
  0x4b   :  { %v1841_v41 = vld [vmem:[%s2475_s8 + $0x44] ss:$28 sps:$4 sm:$0xff]   ;;  %v763_v53 = vld [vmem:[%s2468_s1 + $0x8] sm:$0xff] }
  0x4c   :  { %v1857_v48 = vld [vmem:[%s2475_s8 + $0xe8] ss:$28 sps:$4 sm:$0xff]   ;;  %v1863_v50 = vld [vmem:[%s2475_s8 + $0x120] ss:$28 sps:$4 sm:$0xff]   ;;  %v765_v58 = vmul.f32 0.1, %v763_v53 }
  0x4d   :  { %1712 = vmatpush3.bf16.msra.mxu1 %v1822_v59  ;;  %1730 = vmatpush3.bf16.msra.mxu0 %v1829_v36  ;;  %v1865_v49 = vld [vmem:[%s2475_s8 + $0x124] ss:$28 sps:$4 sm:$0xff]   ;;  %v1885_v36 = vld [vmem:[%s2475_s8 + $0x50] ss:$28 sps:$4 sm:$0xff]   ;;  %v1908_v53 = vld [vmem:[%s2475_s8 + $0x19c] ss:$28 sps:$4 sm:$0xff]  }
  0x4e   :  { %1713 = vmatprep.subr.bf16.mxu1 %v1962_v38  ;;  %1229 = vmatprep.subr.bf16.mxu0 %v1832_v37  ;;  %v1543_v51 = vld [vmem:[%s2472_s5] ss:$0 sm:$0xff]  ;;  %v1882_v35 = vld [vmem:[%s2475_s8 + $0x48] ss:$28 sps:$4 sm:$0xff]  }
  0x4f   :  { %v762_v52 = vld [vmem:[%s2468_s1] sm:$0xff] }
  0x50   :  { %v764_v56 = vmul.f32 0.1, %v762_v52  ;;  %v1888_v37 = vld [vmem:[%s2475_s8 + $0x84] ss:$28 sps:$4 sm:$0xff]  }
  0x51   :  { %1714 = vmatpush3.bf16.msra.mxu1 %v1823_v60  ;;  %v1905_v52 = vld [vmem:[%s2475_s8 + $0x168] ss:$28 sps:$4 sm:$0xff]  }
  0x52   :  { %1715 = vmatprep.subr.bf16.mxu1 %v1962_v38 }
  0x55   :  { %1716 = vmatpush3.bf16.msra.mxu1 %v1824_v61 }
  0x56   :  { %1717 = vmatprep.subr.bf16.mxu1 %v1962_v38 }
  0x59   :  { %1718 = vmatpush3.bf16.msra.mxu1 %v1825_v62 }
  0x5a   :  { %1719 = vmatprep.subr.bf16.mxu1 %v1962_v38 }
  0x5d   :  { %1720 = vmatpush3.bf16.msra.mxu1 %v1826_v63 }
  0x5e   :  { %1721 = vmatprep.subr.bf16.mxu1 %v1962_v38 }
  0x61   :  { %1722 = vmatpush3.bf16.msra.mxu1 %v1827_v0  ;;  %v1830_v0 = vld [vmem:[%s2475_s8] ss:$28 sps:$4 sm:$0xff]  }
  0x62   :  { %1272 = vmatprep.subr.bf16.mxu1 %v1835_v40  ;;  %v1889_v40 = vld [vmem:[%s2475_s8 + $0x88] ss:$28 sps:$4 sm:$0xff]  }
  0xf5   :  { %v1628_v1 = vpop.f32.mrb[0].mxu0 }
  0xf6   :  { %v1629_v3 = vpop.f32.mrb[1].mxu0 }
  0xf7   :  { %v1630_v4 = vadd.f32 %v1629_v3, %v1628_v1  ;;  %v1631_v5 = vpop.f32.mrb[2].mxu0  ;;  %v1650_v6 = vpop.f32.mrb[0].mxu1  ;;  %v1836_v3 = vld [vmem:[%s2475_s8 + $0x38] ss:$28 sps:$4 sm:$0xff]  }
  0xf8   :  { %v1632_v7 = vpop.f32.mrb[3].mxu0  ;;  %v1651_v10 = vpop.f32.mrb[1].mxu1 }
  0xf9   :  { %v518_v8 = vadd.f32 %v1630_v4, %v1485_v2  ;;  %v1633_v9 = vadd.f32 %v1632_v7, %v1631_v5  ;;  %v1652_v11 = vadd.f32 %v1651_v10, %v1650_v6  ;;  %v1653_v12 = vpop.f32.mrb[2].mxu1  ;;  %v1844_v4 = vld [vmem:[%s2475_s8 + $0x74] ss:$28 sps:$4 sm:$0xff]   ;;  %v1850_v6 = vld [vmem:[%s2475_s8 + $0xac] ss:$28 sps:$4 sm:$0xff]  }
  0xfa   :  { %v1654_v14 = vpop.f32.mrb[3].mxu1  ;;  %v1842_v5 = vld [vmem:[%s2475_s8 + $0x70] ss:$28 sps:$4 sm:$0xff]   ;;  %v1848_v7 = vld [vmem:[%s2475_s8 + $0xa8] ss:$28 sps:$4 sm:$0xff]  }
  0xfb   :  { %v521_v13 = vadd.f32 %v1633_v9, %v1485_v2  ;;  %v559_v15 = vadd.f32 %v1652_v11, %v518_v8  ;;  %v1655_v16 = vadd.f32 %v1654_v14, %v1653_v12  ;;  %v1838_v2 = vld [vmem:[%s2475_s8 + $0x3c] ss:$28 sps:$4 sm:$0xff]   ;;  %v1856_v8 = vld [vmem:[%s2475_s8 + $0xe4] ss:$28 sps:$4 sm:$0xff]   ;;  %v1868_v12 = vld [vmem:[%s2475_s8 + $0x154] ss:$28 sps:$4 sm:$0xff]  }
  0xfc   :  { %v1854_v9 = vld [vmem:[%s2475_s8 + $0xe0] ss:$28 sps:$4 sm:$0xff]   ;;  %v1860_v11 = vld [vmem:[%s2475_s8 + $0x118] ss:$28 sps:$4 sm:$0xff]   ;;  %v1866_v14 = vld [vmem:[%s2475_s8 + $0x150] ss:$28 sps:$4 sm:$0xff]  }
  0xfd   :  { %v562_v17 = vadd.f32 %v1655_v16, %v521_v13  ;;  %v1862_v10 = vld [vmem:[%s2475_s8 + $0x11c] ss:$28 sps:$4 sm:$0xff]   ;;  %v1874_v16 = vld [vmem:[%s2475_s8 + $0x18c] ss:$28 sps:$4 sm:$0xff]  }
  0xfe   :  { %v1871_v13 = vld [vmem:[%s2475_s8 + $0x15c] ss:$28 sps:$4 sm:$0xff]  }
  0xff   :  { %v640_v18 = vpop.f32.mrb[4].mxu1 }
 0x100   :  { %v1705_v19 = vpop.f32.mrb[5].mxu1 }
 0x101   :  { %v643_v20 = vpop.f32.mrb[6].mxu1  ;;  %v1875_v19 = vld [vmem:[%s2475_s8 + $0x190] ss:$28 sps:$4 sm:$0xff]  }
 0x102   :  { %v1706_v21 = vpop.f32.mrb[7].mxu1 }
 0x103   :  { %v1964_v21 = vmov 0  }
 0x115   :  { %v1672_v22 = vpop.f32.mrb[4].mxu0 }
 0x116   :  { %v1673_v23 = vpop.f32.mrb[5].mxu0 }
 0x117   :  { %v1674_v24 = vadd.f32 %v1673_v23, %v1672_v22  ;;  %v1675_v25 = vpop.f32.mrb[6].mxu0  ;;  %v1552_v22 = vld [vmem:[%s2474_s7] ss:$0 sm:$0xff] }
 0x118   :  { %v1676_v26 = vpop.f32.mrb[7].mxu0 }
 0x119   :  { %v600_v27 = vadd.f32 %v1674_v24, %v559_v15  ;;  %v1677_v28 = vadd.f32 %v1676_v26, %v1675_v25  ;;  %v1869_v15 = vld [vmem:[%s2475_s8 + $0x158] ss:$28 sps:$4 sm:$0xff]  }
 0x11b   :  { %v641_v29 = vadd.f32 %v640_v18, %v600_v27  ;;  %v603_v30 = vadd.f32 %v1677_v28, %v562_v17  ;;  %v1877_v17 = vld [vmem:[%s2475_s8 + $0x194] ss:$28 sps:$4 sm:$0xff]   ;;  %v1872_v18 = vld [vmem:[%s2475_s8 + $0x188] ss:$28 sps:$4 sm:$0xff]  }
 0x11d   :  { %v644_v31 = vadd.f32 %v643_v20, %v603_v30  ;;  %v647_v32 = vmax.f32 %v641_v29, 0.0  ;;  %v1880_v20 = vld [vmem:[%s2475_s8 + $0x14] ss:$28 sps:$4 sm:$0xff]  }
 0x11f   :  { %v648_v33 = vmax.f32 %v644_v31, 0.0  ;;  %v1878_v31 = vld [vmem:[%s2475_s8 + $0x10] ss:$28 sps:$4 sm:$0xff]  }
 0x121   :  { %v649_v34 = vpack.c.bf16 %v648_v33, %v647_v32  ;;  %v1881_v32 = vld [vmem:[%s2475_s8 + $0x18] ss:$28 sps:$4 sm:$0xff]  }
 0x123   :  { %1724 = vmatmul.mubr.bf16.vlgmr.msra.gmra.mrb[8].mxu1 %v649_v34  ;;  %v1884_v34 = vld [vmem:[%s2475_s8 + $0x4c] ss:$28 sps:$4 sm:$0xff]  }
 0x124   :  { %1273 = vmatpush1.bf16.msra.mxu1 %v1833_v39  ;;  %1304 = vmatprep.mubr.bf16.mxu1 %v1964_v21  ;;  %v1886_v39 = vld [vmem:[%s2475_s8 + $0x80] ss:$28 sps:$4 sm:$0xff]  }
 0x125   :  { %1274 = vmatprep.subr.bf16.mxu1 %v1841_v41  ;;  %v1892_v41 = vld [vmem:[%s2475_s8 + $0xbc] ss:$28 sps:$4 sm:$0xff]  }
 0x128   :  { %1275 = vmatpush1.bf16.msra.mxu1 %v1839_v42  ;;  %v1890_v42 = vld [vmem:[%s2475_s8 + $0xb8] ss:$28 sps:$4 sm:$0xff]  }
 0x129   :  { %1276 = vmatprep.subr.bf16.mxu1 %v1847_v43  ;;  %v1893_v43 = vld [vmem:[%s2475_s8 + $0xc0] ss:$28 sps:$4 sm:$0xff]  }
 0x12c   :  { %1277 = vmatpush1.bf16.msra.mxu1 %v1845_v44  ;;  %v1896_v44 = vld [vmem:[%s2475_s8 + $0xf4] ss:$28 sps:$4 sm:$0xff]  }
 0x12d   :  { %1278 = vmatprep.subr.bf16.mxu1 %v1853_v45  ;;  %v1894_v45 = vld [vmem:[%s2475_s8 + $0xf0] ss:$28 sps:$4 sm:$0xff]  }
 0x130   :  { %1279 = vmatpush1.bf16.msra.mxu1 %v1851_v46  ;;  %v1897_v46 = vld [vmem:[%s2475_s8 + $0xf8] ss:$28 sps:$4 sm:$0xff]  }
 0x131   :  { %1280 = vmatprep.subr.bf16.mxu1 %v1859_v47  ;;  %v1900_v47 = vld [vmem:[%s2475_s8 + $0x12c] ss:$28 sps:$4 sm:$0xff]  }
 0x134   :  { %1281 = vmatpush1.bf16.msra.mxu1 %v1857_v48  ;;  %v1898_v48 = vld [vmem:[%s2475_s8 + $0x128] ss:$28 sps:$4 sm:$0xff]  }
 0x135   :  { %1282 = vmatprep.subr.bf16.mxu1 %v1865_v49  ;;  %v1901_v49 = vld [vmem:[%s2475_s8 + $0x130] ss:$28 sps:$4 sm:$0xff]  }
 0x138   :  { %1283 = vmatpush1.bf16.msra.mxu1 %v1863_v50  ;;  %v1904_v50 = vld [vmem:[%s2475_s8 + $0x164] ss:$28 sps:$4 sm:$0xff]  }
 0x139   :  { %1284 = vmatprep.subr.bf16.mxu1 %v1871_v13 }
 0x13c   :  { %1285 = vmatpush1.bf16.msra.mxu1 %v1869_v15 }
 0x13d   :  { %1286 = vmatprep.subr.bf16.mxu1 %v1877_v17 }
 0x140   :  { %1287 = vmatpush1.bf16.msra.mxu1 %v1875_v19 }
 0x141   :  { %1735 = vmatprep.subr.bf16.mxu1 %v1962_v38 }
 0x1f6   :  { %v755_v54 = vpop.f32.mrb[8].mxu1 }
 0x1f7   :  { %v756_v55 = vadd.f32 %v1543_v51, %v755_v54  ;;  %v1725_v57 = vpop.f32.mrb[9].mxu1  ;;  %v1906_v54 = vld [vmem:[%s2475_s8 + $0x198] ss:$28 sps:$4 sm:$0xff]  }
 0x1f8   :  { %v758_v59 = vpop.f32.mrb[10].mxu1 }
 0x1f9   :  { %v759_v60 = vadd.f32 %v1543_v51, %v758_v59  ;;  %v1726_v61 = vpop.f32.mrb[11].mxu1  ;;  %v766_v62 = vadd.f32 %v764_v56, %v756_v55  ;;  %v1902_v51 = vld [vmem:[%s2475_s8 + $0x160] ss:$28 sps:$4 sm:$0xff]   ;;  %v906_v56 = vlaneseq }
 0x1fa   :  { %v1909_v55 = vld [vmem:[%s2475_s8 + $0x1a0] ss:$28 sps:$4 sm:$0xff]   ;;  %s1965_s8 = smov [#allocation2]  }
 0x1fb   :  { %v767_v63 = vadd.f32 %v765_v58, %v759_v60  ;;  %v2432_v57 = vshrl.u32 %v906_v56, 7  ;;  %v2439_v60 = vld [vmem:[%s2476_s9] sm:$0x7f]  ;;  %s1474_s9 = sshll.u32 %s1965_s8, 4  ;;  %s1475_s9 = int_to_ptr.vmem [resolvable:$true] %s1474_s9 }
 0x1fc   :  { %s1938_s12 = scalar_lea.vmem %s1475_s9, 1792  ;;  %p1943_p1 = scmp.lt.s32.totalorder %s1475_s9, %s1475_s9 }
 0x1fd   :  { %v768_v1 = vpack.c.bf16 %v767_v63, %v766_v62  ;;  %v908_v58 = vsub.s32 0, %v2432_v57  ;;  %v916_v59 = vsub.s32 2, %v2432_v57  ;;  %v912_v61 = vsub.s32 1, %v2432_v57  ;;  %p1939_p0 = scmp.ne.s32.totalorder %s1475_s9, %s1938_s12  ;;  %p1944_p2 = scmp.lt.s32.totalorder %s1938_s12, %s1938_s12 }
 0x1ff   :  { %1732 = vmatmul.mubr.msk.bf16.vlgmr.msra.gmra.mrb[8].mxu0 %vm792_vm2, %v768_v1  ;;  %v909_v62 = vrot.slane %v2439_v60, %v908_v58  ;;  %v917_v63 = vrot.slane %v2439_v60, %v916_v59  ;;  %p1945_p3 = por %p1944_p2, %p1943_p1 }
 0x200   :  { %1230 = vmatpush1.bf16.msra.mxu0 %v1830_v0  ;;  %1261 = vmatprep.mubr.bf16.mxu0 %v1964_v21  ;;  %v913_v0 = vrot.slane %v2439_v60, %v912_v61 }
 0x201   :  { %1231 = vmatprep.subr.bf16.mxu0 %v1838_v2  ;;  %p1946_p4 = pnand %p1945_p3, %p1939_p0 }
 0x204   :  { %1232 = vmatpush1.bf16.msra.mxu0 %v1836_v3 }
 0x205   :  { %1233 = vmatprep.subr.bf16.mxu0 %v1844_v4 }
 0x208   :  { %1234 = vmatpush1.bf16.msra.mxu0 %v1842_v5 }
 0x209   :  { %1235 = vmatprep.subr.bf16.mxu0 %v1850_v6 }
 0x20c   :  { %1236 = vmatpush1.bf16.msra.mxu0 %v1848_v7 }
 0x20d   :  { %1237 = vmatprep.subr.bf16.mxu0 %v1856_v8 }
 0x210   :  { %1238 = vmatpush1.bf16.msra.mxu0 %v1854_v9 }
 0x211   :  { %1239 = vmatprep.subr.bf16.mxu0 %v1862_v10 }
 0x214   :  { %1240 = vmatpush1.bf16.msra.mxu0 %v1860_v11 }
 0x215   :  { %1241 = vmatprep.subr.bf16.mxu0 %v1868_v12 }
 0x218   :  { %1242 = vmatpush1.bf16.msra.mxu0 %v1866_v14 }
 0x219   :  { %1243 = vmatprep.subr.bf16.mxu0 %v1874_v16 }
 0x21c   :  { %1244 = vmatpush1.bf16.msra.mxu0 %v1872_v18 }
 0x21d   :  { %1315 = vmatprep.subr.bf16.mxu0 %v1880_v20 }
 0x2d2   :  { %v830_v23 = vpop.f32.mrb[8].mxu0 }
 0x2d3   :  { %v831_v24 = vadd.f32 %v1552_v22, %v830_v23  ;;  %v1733_v25 = vpop.f32.mrb[9].mxu0 }
 0x2d4   :  { %v833_v26 = vpop.f32.mrb[10].mxu0 }
 0x2d5   :  { %v834_v27 = vadd.f32 %v1552_v22, %v833_v26  ;;  %v1734_v28 = vpop.f32.mrb[11].mxu0  ;;  %v837_v29 = vmax.f32 %v831_v24, 0.0 }
 0x2d7   :  { %v838_v30 = vmax.f32 %v834_v27, 0.0 }
 0x2d9   :  { %v839_v33 = vpack.c.bf16 %v838_v30, %v837_v29 }
 0x2db   :  { %1262 = vmatmul.mubr.bf16.vlgmr.msra.gmra.mrb[12].mxu0 %v839_v33  ;;  %1305 = vmatmul.mubr.bf16.vlgmr.msra.gmra.mrb[12].mxu1 %v839_v33 }
 0x2dc   :  { %1316 = vmatpush1.bf16.msra.mxu0 %v1878_v31  ;;  %1736 = vmatpush3.bf16.msra.mxu1 %v1881_v32 }
 0x2dd   :  { %1317 = vmatprep.subr.bf16.mxu0 %v1884_v34  ;;  %1737 = vmatprep.subr.bf16.mxu1 %v1962_v38 }
 0x2de   :  { %1347 = vmatprep.mubr.bf16.mxu0 %v1964_v21  ;;  %1751 = vmatprep.mubr.msk.bf16.mxu1 %vm1963_vm0, %v1962_v38 }
 0x2e0   :  { %1318 = vmatpush1.bf16.msra.mxu0 %v1882_v35  ;;  %1738 = vmatpush3.bf16.msra.mxu1 %v1885_v36 }
 0x2e1   :  { %1319 = vmatprep.subr.bf16.mxu0 %v1888_v37  ;;  %1739 = vmatprep.subr.bf16.mxu1 %v1962_v38 }
 0x2e4   :  { %1320 = vmatpush1.bf16.msra.mxu0 %v1886_v39  ;;  %1740 = vmatpush3.bf16.msra.mxu1 %v1889_v40 }
 0x2e5   :  { %1321 = vmatprep.subr.bf16.mxu0 %v1892_v41  ;;  %1741 = vmatprep.subr.bf16.mxu1 %v1962_v38 }
 0x2e8   :  { %1322 = vmatpush1.bf16.msra.mxu0 %v1890_v42  ;;  %1742 = vmatpush3.bf16.msra.mxu1 %v1893_v43 }
 0x2e9   :  { %1323 = vmatprep.subr.bf16.mxu0 %v1896_v44  ;;  %1743 = vmatprep.subr.bf16.mxu1 %v1962_v38 }
 0x2ec   :  { %1324 = vmatpush1.bf16.msra.mxu0 %v1894_v45  ;;  %1744 = vmatpush3.bf16.msra.mxu1 %v1897_v46 }
 0x2ed   :  { %1325 = vmatprep.subr.bf16.mxu0 %v1900_v47  ;;  %1745 = vmatprep.subr.bf16.mxu1 %v1962_v38 }
 0x2f0   :  { %1326 = vmatpush1.bf16.msra.mxu0 %v1898_v48  ;;  %1746 = vmatpush3.bf16.msra.mxu1 %v1901_v49 }
 0x2f1   :  { %1327 = vmatprep.subr.bf16.mxu0 %v1904_v50  ;;  %1747 = vmatprep.subr.bf16.mxu1 %v1962_v38 }
 0x2f4   :  { %1328 = vmatpush1.bf16.msra.mxu0 %v1902_v51  ;;  %1748 = vmatpush3.bf16.msra.mxu1 %v1905_v52  ;;  %v924_v51 = vsub.s32 4, %v2432_v57  ;;  %v932_v52 = vsub.s32 6, %v2432_v57 }
 0x2f5   :  { %1329 = vmatprep.subr.bf16.mxu0 %v1908_v53  ;;  %1749 = vmatprep.subr.bf16.mxu1 %v1962_v38  ;;  %v920_v38 = vsub.s32 3, %v2432_v57  ;;  %v928_v53 = vsub.s32 5, %v2432_v57 }
 0x2f7   :  { %v921_v1 = vrot.slane %v2439_v60, %v920_v38  ;;  %v929_v56 = vrot.slane %v2439_v60, %v928_v53 }
 0x2f8   :  { %1330 = vmatpush1.bf16.msra.mxu0 %v1906_v54  ;;  %1750 = vmatpush3.bf16.msra.mxu1 %v1909_v55  ;;  %v925_v54 = vrot.slane %v2439_v60, %v924_v51  ;;  %v933_v55 = vrot.slane %v2439_v60, %v932_v52 }
 0x2fb   :  { %1348 = vmatmul.mubr.bf16.vlgmr.msra.gmra.mrb[16].mxu0 %v839_v33  ;;  %1752 = vmatmul.mubr.bf16.vlgmr.msra.gmra.mrb[16].mxu1 %v839_v33 }
 0x3ae   :  { %v1263_v2 = vpop.f32.mrb[12].mxu0  ;;  %v1306_v3 = vpop.f32.mrb[12].mxu1 }
 0x3af   :  { %v1264_v4 = vadd.f32 %v1263_v2, %v909_v62  ;;  %v1307_v5 = vadd.f32 %v1306_v3, %v917_v63  ;;  %v1265_v6 = vpop.f32.mrb[13].mxu0  ;;  %v1308_v7 = vpop.f32.mrb[13].mxu1 }
 0x3b0   :  { %v1266_v8 = vadd.f32 %v1265_v6, %v913_v0  ;;  %v1309_v9 = vadd.f32 %v1308_v7, %v921_v1  ;;  %v1267_v10 = vpop.f32.mrb[14].mxu0  ;;  %v1310_v11 = vpop.f32.mrb[14].mxu1 }
 0x3b1   :  { %v1399_v12 = vmul.f32 0.5, %v1264_v4  ;;  %v1401_v13 = vmul.f32 0.5, %v1307_v5  ;;  %v1268_v14 = vadd.f32 %v1267_v10, %v909_v62  ;;  %v1311_v15 = vadd.f32 %v1310_v11, %v917_v63  ;;  %v1269_v16 = vpop.f32.mrb[15].mxu0  ;;  %v1312_v17 = vpop.f32.mrb[15].mxu1 }
 0x3b2   :  { %v1400_v18 = vmul.f32 0.5, %v1266_v8  ;;  %v1402_v19 = vmul.f32 0.5, %v1309_v9  ;;  %v1270_v20 = vadd.f32 %v1269_v16, %v913_v0  ;;  %v1313_v21 = vadd.f32 %v1312_v17, %v921_v1 }
 0x3b3   :  { %1910 = vtanh.f32 %v1399_v12  ;;  %v1406_v22 = vmul.f32 0.5, %v1268_v14  ;;  %v1408_v23 = vmul.f32 0.5, %v1311_v15 }
 0x3b4   :  { %1912 = vtanh.f32 %v1401_v13  ;;  %v1407_v24 = vmul.f32 0.5, %v1270_v20  ;;  %v1409_v25 = vmul.f32 0.5, %v1313_v21 }
 0x3b5   :  { %1914 = vtanh.f32 %v1400_v18 }
 0x3b6   :  { %1916 = vtanh.f32 %v1402_v19 }
 0x3b7   :  { %1918 = vtanh.f32 %v1406_v22 }
 0x3b8   :  { %1920 = vtanh.f32 %v1408_v23 }
 0x3b9   :  { %1922 = vtanh.f32 %v1407_v24 }
 0x3ba   :  { %1924 = vtanh.f32 %v1409_v25 }
 0x3bd   :  { %v1911_v26 = vpop.eup %1910 }
 0x3be   :  { %v1913_v27 = vpop.eup %1912  ;;  %v1427_v28 = vmul.f32 0.5, %v1911_v26 }
 0x3bf   :  { %v1915_v29 = vpop.eup %1914  ;;  %v1429_v30 = vmul.f32 0.5, %v1913_v27 }
 0x3c0   :  { %v1917_v31 = vpop.eup %1916  ;;  %v1441_v32 = vadd.f32 0.5, %v1427_v28  ;;  %v1428_v33 = vmul.f32 0.5, %v1915_v29 }
 0x3c1   :  { %v1919_v34 = vpop.eup %1918  ;;  %v1443_v35 = vadd.f32 0.5, %v1429_v30  ;;  %v1430_v36 = vmul.f32 0.5, %v1917_v31 }
 0x3c2   :  { %v1921_v37 = vpop.eup %1920  ;;  %1455 = vst [vmem:[#allocation2] sm:$0xff] %v1441_v32  ;;  %v1442_v39 = vadd.f32 0.5, %v1428_v33  ;;  %v1434_v40 = vmul.f32 0.5, %v1919_v34 }
 0x3c3   :  { %v1923_v41 = vpop.eup %1922  ;;  %1457 = vst [vmem:[#allocation2 + $0x10] sm:$0xff] %v1443_v35  ;;  %v1444_v42 = vadd.f32 0.5, %v1430_v36  ;;  %v1436_v43 = vmul.f32 0.5, %v1921_v37 }
 0x3c4   :  { %v1925_v44 = vpop.eup %1924  ;;  %1456 = vst [vmem:[#allocation2 + $0x8] sm:$0xff] %v1442_v39  ;;  %v1448_v45 = vadd.f32 0.5, %v1434_v40  ;;  %v1435_v46 = vmul.f32 0.5, %v1923_v41 }
 0x3c5   :  { %1458 = vst [vmem:[#allocation2 + $0x18] sm:$0xff] %v1444_v42  ;;  %v1450_v47 = vadd.f32 0.5, %v1436_v43  ;;  %v1437_v48 = vmul.f32 0.5, %v1925_v44 }
 0x3c6   :  { %1462 = vst [vmem:[#allocation2 + $0x38] sm:$0xff] %v1448_v45  ;;  %v1449_v49 = vadd.f32 0.5, %v1435_v46 }
 0x3c7   :  { %1464 = vst [vmem:[#allocation2 + $0x48] sm:$0xff] %v1450_v47  ;;  %v1451_v50 = vadd.f32 0.5, %v1437_v48 }
 0x3c8   :  { %1463 = vst [vmem:[#allocation2 + $0x40] sm:$0xff] %v1449_v49 }
 0x3c9   :  { %1465 = vst [vmem:[#allocation2 + $0x50] sm:$0xff] %v1451_v50 }
 0x3ce   :  { %v1349_v58 = vpop.f32.mrb[16].mxu0  ;;  %v1392_v59 = vpop.f32.mrb[16].mxu1 }
 0x3cf   :  { %v1350_v61 = vadd.f32 %v1349_v58, %v925_v54  ;;  %v1393_v38 = vadd.f32 %v1392_v59, %v933_v55  ;;  %v1351_v62 = vpop.f32.mrb[17].mxu0  ;;  %v1753_v63 = vpop.f32.mrb[17].mxu1 }
 0x3d0   :  { %v1352_v0 = vadd.f32 %v1351_v62, %v929_v56  ;;  %v1353_v1 = vpop.f32.mrb[18].mxu0  ;;  %v1395_v2 = vpop.f32.mrb[18].mxu1 }
 0x3d1   :  { %v1403_v3 = vmul.f32 0.5, %v1350_v61  ;;  %v1405_v4 = vmul.f32 0.5, %v1393_v38  ;;  %v1354_v5 = vadd.f32 %v1353_v1, %v925_v54  ;;  %v1396_v57 = vadd.f32 %v1395_v2, %v933_v55  ;;  %v1355_v6 = vpop.f32.mrb[19].mxu0  ;;  %v1754_v7 = vpop.f32.mrb[19].mxu1 }
 0x3d2   :  { %v1404_v8 = vmul.f32 0.5, %v1352_v0  ;;  %v1356_v9 = vadd.f32 %v1355_v6, %v929_v56 }
 0x3d3   :  { %1926 = vtanh.f32 %v1403_v3  ;;  %v1410_v10 = vmul.f32 0.5, %v1354_v5  ;;  %v1412_v60 = vmul.f32 0.5, %v1396_v57 }
 0x3d4   :  { %1928 = vtanh.f32 %v1405_v4  ;;  %v1411_v11 = vmul.f32 0.5, %v1356_v9 }
 0x3d5   :  { %1930 = vtanh.f32 %v1404_v8 }
 0x3d6   :  { %1932 = vtanh.f32 %v1410_v10 }
 0x3d7   :  { %1934 = vtanh.f32 %v1412_v60 }
 0x3d8   :  { %1936 = vtanh.f32 %v1411_v11 }
 0x3dd   :  { %v1927_v12 = vpop.eup %1926 }
 0x3de   :  { %v1929_v13 = vpop.eup %1928  ;;  %v1431_v14 = vmul.f32 0.5, %v1927_v12 }
 0x3df   :  { %v1931_v15 = vpop.eup %1930  ;;  %v1433_v16 = vmul.f32 0.5, %v1929_v13 }
 0x3e0   :  { %v1933_v17 = vpop.eup %1932  ;;  %v1445_v18 = vadd.f32 0.5, %v1431_v14  ;;  %v1432_v19 = vmul.f32 0.5, %v1931_v15 }
 0x3e1   :  { %v1935_v20 = vpop.eup %1934  ;;  %v1447_v21 = vadd.f32 0.5, %v1433_v16  ;;  %v1438_v22 = vmul.f32 0.5, %v1933_v17 }
 0x3e2   :  { %v1937_v23 = vpop.eup %1936  ;;  %1459 = vst [vmem:[#allocation2 + $0x20] sm:$0xff] %v1445_v18  ;;  %v1446_v24 = vadd.f32 0.5, %v1432_v19  ;;  %v1440_v25 = vmul.f32 0.5, %v1935_v20 }
 0x3e3   :  { %1461 = vst.msk [vmem:[#allocation2 + $0x30] sm:$0xff] %vm479_vm1, %v1447_v21  ;;  %v1452_v26 = vadd.f32 0.5, %v1438_v22  ;;  %v1439_v27 = vmul.f32 0.5, %v1937_v23 }
 0x3e4   :  { %1460 = vst [vmem:[#allocation2 + $0x28] sm:$0xff] %v1446_v24  ;;  %v1454_v28 = vadd.f32 0.5, %v1440_v25 }
 0x3e5   :  { %1466 = vst [vmem:[#allocation2 + $0x58] sm:$0xff] %v1452_v26  ;;  %v1453_v29 = vadd.f32 0.5, %v1439_v27 }
 0x3e6   :  { %1468 = vst.msk [vmem:[#allocation2 + $0x68] sm:$0xff] %vm479_vm1, %v1454_v28 }
 0x3e7   :  { %1467 = vst [vmem:[#allocation2 + $0x60] sm:$0xff] %v1453_v29 }
 0x3e8   :  { %1949 = shalt.err (!%p1946_p4)
}
 0x3e9   :  { %s1950_s15 = scalar_lea.hbm %s2477_s10, 1792 }
 0x3ea   :  { %p1951_p5 = scmp.ne.s32.totalorder %s2477_s10, %s1950_s15  ;;  %p1954_p6 = scmp.lt.u32.totalorder %s1950_s15, %s2477_s10 }
 0x3ec   :  { %p1956_p7 = pnand %p1954_p6, %p1951_p5 }
 0x3ee   :  { %1959 = shalt.err (!%p1956_p7)
}
 0x3ef   :  { %s1966_s20 = smov 896   ;;  %s1967_s3 = smov 56  }
 0x3f0   :  { %1480 = dma.vmem_to_hbm [thread:$0]  %s1475_s9, 1792, %s2477_s10, [#allocation3], %s1966_s20, %s1966_s20, %s1967_s3  }
 0x3f1   :  { %1960 = dma.done.wait [#allocation3], 1792  }
 0x3f2   :  { %1961 = vsyncadd [#allocation3], 4294965504 }
 0x3f3   :  { %1484 = vsyncpa [#allocation3], 1 }

</bundles_post_ra>
